<compile_context>
chip_gen: v7x
topology: tpu7x:2x2x1
jax: 0.10.0
libtpu: 0.0.40
codegen_flags: <defaults>
</compile_context>

<pallas_src>
import functools

import jax
import jax.numpy as jnp
from jax.experimental import pallas as pl
from jax.experimental.pallas import tpu as pltpu


def _layer_scale_kernel(x_ref, gamma_ref, o_ref):
    # x_ref: (tile_rows, L) in VMEM; gamma_ref: (1, L) float32 in VMEM.
    # Pure VPU elementwise multiply; gamma lane-broadcasts across rows.
    x = x_ref[...].astype(jnp.float32)
    o_ref[...] = (x * gamma_ref[...]).astype(o_ref.dtype)


def _layer_scale_pallas_2d(x2d, gamma_row, *, block_bytes, donate_x):
    """Run the Pallas kernel on a lane-layout-decided 2D slab.

    x2d: (rows, L) in x's dtype; gamma_row: (1, L) float32.
    """
    rows, L = x2d.shape
    dtype_bytes = jnp.dtype(x2d.dtype).itemsize
    sublane = {1: 32, 2: 16}.get(dtype_bytes, 8)

    # Clamp block size so 4*block + headroom stays <= 48 MiB (v7x has 64 MiB
    # physical VMEM; v5e/v6e have 128 MiB, so this is safe everywhere).
    block_bytes = min(block_bytes, 10 << 20)
    target_rows = max(sublane, block_bytes // (L * dtype_bytes))
    target_rows = (target_rows // sublane) * sublane

    # Never emit a 1-step grid when the slab can be split: >= 4 steps restores
    # input/output DMA overlap and gives each v7x TensorCore several steps.
    quarter = ((rows // 4) // sublane) * sublane
    if quarter >= sublane:
        tile = min(target_rows, quarter)
    else:
        tile = min(target_rows, rows)
    if tile >= rows:
        tile = rows  # single full block (row dim == full array dim is legal)

    grid = (pl.cdiv(rows, tile),)  # Pallas masks the ragged edge block.

    block_vmem = tile * L * dtype_bytes
    vmem_limit = min(48 << 20, 4 * block_vmem + (8 << 20))

    cost = pl.CostEstimate(
        flops=rows * L,
        transcendentals=0,
        bytes_accessed=2 * rows * L * dtype_bytes + L * 4,
    )

    return pl.pallas_call(
        _layer_scale_kernel,
        out_shape=jax.ShapeDtypeStruct((rows, L), x2d.dtype),
        grid_spec=pltpu.PrefetchScalarGridSpec(
            num_scalar_prefetch=0,
            grid=grid,
            in_specs=[
                pl.BlockSpec((tile, L), lambda i: (i, 0)),
                pl.BlockSpec((1, L), lambda i: (0, 0)),
            ],
            out_specs=pl.BlockSpec((tile, L), lambda i: (i, 0)),
        ),
        compiler_params=pltpu.CompilerParams(
            dimension_semantics=("parallel",),
            vmem_limit_bytes=vmem_limit,
        ),
        cost_estimate=cost,
        input_output_aliases=({0: 0} if donate_x else {}),
    )(x2d, gamma_row)


def layer_scale(x, gamma, *, block_bytes=8 << 20, min_bytes_for_kernel=256 * 1024,
                donate_x=False):
    """LayerScale forward: x * gamma. x: (..., D), gamma: (D,).

    donate_x=True aliases x to the output (use with jit donate_argnums) —
    the JAX analogue of the PyTorch `inplace=True` path.
    """
    *lead, D = x.shape
    rows = 1
    for s in lead:
        rows *= s
    dtype_bytes = jnp.dtype(x.dtype).itemsize
    total_bytes = rows * D * dtype_bytes

    gamma_f32 = gamma.astype(jnp.float32)

    # Small-input bypass: pallas_call dispatch + per-step overhead dwarfs the
    # work at KiB sizes; XLA fuses this broadcast-multiply for free.
    if total_bytes < min_bytes_for_kernel or rows == 0:
        return (x.astype(jnp.float32) * gamma_f32).astype(x.dtype)

    x2d = x.reshape(rows, D)

    # Lane-dense repack: with D < 128 every vreg/store would be mostly padding
    # (masked vst). Pack p = 128 // D logical rows per 128-lane row; gamma is
    # tiled p times so the per-channel scale still lines up lane-for-lane.
    if D % 128 != 0 and 128 % D == 0:
        pack = 128 // D
        tail = rows % pack
        bulk = rows - tail
        gamma_row = jnp.tile(gamma_f32, pack).reshape(1, 128)
        if tail == 0:
            xp = x2d.reshape(rows // pack, 128)  # contiguous reshape: free
            out2d = _layer_scale_pallas_2d(
                xp, gamma_row, block_bytes=block_bytes, donate_x=donate_x
            ).reshape(rows, D)
        elif bulk == 0:
            # Fewer than `pack` rows total: nothing worth a kernel launch.
            out2d = (x2d.astype(jnp.float32) * gamma_f32).astype(x.dtype)
        else:
            # Keep the 4x lane-density win for the bulk; <= pack-1 ragged tail
            # rows go through plain XLA and are concatenated back.
            xp = x2d[:bulk].reshape(bulk // pack, 128)
            out_bulk = _layer_scale_pallas_2d(
                xp, gamma_row, block_bytes=block_bytes, donate_x=donate_x
            ).reshape(bulk, D)
            out_tail = (x2d[bulk:].astype(jnp.float32) * gamma_f32).astype(x.dtype)
            out2d = jnp.concatenate([out_bulk, out_tail], axis=0)
    else:
        # D already lane-dense (multiple of 128) or not a clean divisor of 128;
        # keep the natural (rows, D) layout.
        gamma_row = gamma_f32.reshape(1, D)
        out2d = _layer_scale_pallas_2d(
            x2d, gamma_row, block_bytes=block_bytes, donate_x=donate_x
        )

    return out2d.reshape(x.shape)


if __name__ == "__main__":
    # Module config: LayerScale(dim=32, init_values=1e-5)
    D = 32
    init_values = 1e-5
    gamma = init_values * jnp.ones((D,), dtype=jnp.float32)

    k1, k2, k3, k4 = jax.random.split(jax.random.PRNGKey(0), 4)

    # 1) Tiny shape (batch=2, seq=8, dim=32): force the Pallas kernel
    #    (lane-dense packed path, single full block).
    x_small = jax.random.normal(k1, (2, 8, D), dtype=jnp.float32)
    out_small = jax.block_until_ready(layer_scale(x_small, gamma,
                                                  min_bytes_for_kernel=0))
    ref_small = x_small * gamma
    assert out_small.shape == x_small.shape and out_small.dtype == x_small.dtype
    assert jnp.allclose(out_small, ref_small, rtol=1e-6, atol=1e-6)

    # 2) Multi-step grid with a masked edge block (packed rows=394, >=4 steps).
    x_big = jax.random.normal(k2, (8, 197, D), dtype=jnp.float32)
    out_big = jax.block_until_ready(layer_scale(x_big, gamma,
                                                block_bytes=64 * 1024,
                                                min_bytes_for_kernel=0))
    assert jnp.allclose(out_big, x_big * gamma, rtol=1e-6, atol=1e-6)

    # 3) Ragged row count (197 rows, pack=4): packed kernel on the bulk (196
    #    rows) + plain-XLA tail (1 row), concatenated.
    x_rag = jax.random.normal(k3, (1, 197, D), dtype=jnp.float32)
    out_rag = jax.block_until_ready(layer_scale(x_rag, gamma,
                                                min_bytes_for_kernel=0))
    assert out_rag.shape == x_rag.shape
    assert jnp.allclose(out_rag, x_rag * gamma, rtol=1e-6, atol=1e-6)

    # 4) bf16 input: multiply stays in f32 so gamma=1e-5 keeps full precision.
    x_bf16 = jax.random.normal(k4, (4, 64, D), dtype=jnp.bfloat16)
    out_bf16 = jax.block_until_ready(layer_scale(x_bf16, gamma,
                                                 min_bytes_for_kernel=0))
    ref_bf16 = (x_bf16.astype(jnp.float32) * gamma).astype(jnp.bfloat16)
    assert out_bf16.dtype == jnp.bfloat16
    assert jnp.allclose(out_bf16.astype(jnp.float32),
                        ref_bf16.astype(jnp.float32), rtol=1e-6, atol=1e-6)

    # 5) Default small-input bypass (plain JAX fused multiply).
    out_bypass = jax.block_until_ready(layer_scale(x_small, gamma))
    assert jnp.allclose(out_bypass, ref_small, rtol=1e-6, atol=1e-6)

    # 6) Donated / in-place-style path (input_output_aliases={0: 0}).
    donated_fn = jax.jit(
        functools.partial(layer_scale, gamma=gamma, min_bytes_for_kernel=0,
                          donate_x=True),
        donate_argnums=0,
    )
    x_donate = x_small * 1.0  # fresh buffer we are allowed to donate
    out_donate = jax.block_until_ready(donated_fn(x_donate))
    assert jnp.allclose(out_donate, ref_small, rtol=1e-6, atol=1e-6)

    # TODO(synk): true in-place mutation (x.mul_) has no JAX equivalent; the
    # donate_x path above is the closest analogue (buffer aliasing, not
    # mutation of the caller's array object).
    print("KERNEL_OK")
</pallas_src>

<mosaic_0001>
module attributes {stable_mosaic.version = 11 : i64} {
  func.func @_layer_scale_kernel(%arg0: i32, %arg1: memref<4x128xf32, #tpu.memory_space<vmem>>, %arg2: memref<1x128xf32, #tpu.memory_space<vmem>>, %arg3: memref<4x128xf32, #tpu.memory_space<vmem>>) attributes {dimension_semantics = [#tpu.dimension_semantics<parallel>], iteration_bounds = array<i64: 1>, scalar_prefetch = 0 : i64, scratch_operands = 0 : i64, tpu.core_type = #tpu.core_type<tc>, window_params = [{transform_indices = @transform_0, window_bounds = array<i64: 4, 128>}, {pipeline_mode = #tpu.pipeline_mode<synchronous>, transform_indices = @transform_1, window_bounds = array<i64: 1, 128>}, {transform_indices = @transform_2, window_bounds = array<i64: 4, 128>}]} {
    %c0 = arith.constant 0 : index
    %c0_0 = arith.constant 0 : index
    %0 = vector.load %arg1[%c0, %c0_0] : memref<4x128xf32, #tpu.memory_space<vmem>>, vector<4x128xf32>
    %c0_1 = arith.constant 0 : index
    %c0_2 = arith.constant 0 : index
    %1 = vector.load %arg2[%c0_1, %c0_2] : memref<1x128xf32, #tpu.memory_space<vmem>>, vector<1x128xf32>
    %2 = vector.broadcast %1 : vector<1x128xf32> to vector<4x128xf32>
    %3 = arith.mulf %0, %2 : vector<4x128xf32>
    %c0_3 = arith.constant 0 : index
    %c0_4 = arith.constant 0 : index
    %4 = vector.load %arg3[%c0_3, %c0_4] : memref<4x128xf32, #tpu.memory_space<vmem>>, vector<4x128xf32>
    tpu.vector_store %arg3[%c0_3, %c0_4], %3 {strides = array<i32>} : memref<4x128xf32, #tpu.memory_space<vmem>>, vector<4x128xf32>,
    return
  }
  func.func @transform_0(%arg0: i32) -> (i32, i32) {
    %c0_i32 = arith.constant 0 : i32
    %c0_i32_0 = arith.constant 0 : i32
    return %arg0, %c0_i32 : i32, i32
  }
  func.func @transform_1(%arg0: i32) -> (i32, i32) {
    %c0_i32 = arith.constant 0 : i32
    %c0_i32_0 = arith.constant 0 : i32
    %c0_i32_1 = arith.constant 0 : i32
    return %c0_i32, %c0_i32_0 : i32, i32
  }
  func.func @transform_2(%arg0: i32) -> (i32, i32) {
    %c0_i32 = arith.constant 0 : i32
    %c0_i32_0 = arith.constant 0 : i32
    return %arg0, %c0_i32 : i32, i32
  }
}

</mosaic_0001>

<bundles_post_ra>
// kernel: tpu_custom_call.1
= control target key start
LH: loop header
LB: loop body
LE: loop exit
PB: predicated region body
PF: predicated region fallthrough
CT: control target
= control target key end

     0   :  { %7 = vsyncpa [#allocation3], 0  ;;  %s144_s0 = inlined_call_operand.hbm [shape: f32[4,128], index: 0, kind: input, shape index: {}]   ;;  %s145_s1 = inlined_call_operand.vmem [shape: f32[1,128], index: 1, kind: input, shape index: {}]   ;;  %s146_s2 = inlined_call_operand.hbm [shape: f32[4,128], index: 2, kind: output, shape index: {}]  }
   0x1   :  { %8 = vsyncpa [#allocation4], 0  ;;  %s100_s9 = smov [#allocation2]   ;;  %s52_s13 = scalar_lea.hbm %s144_s0, 64 }
   0x2   :  { %s15_s10 = sshll.u32 %s100_s9, 4  ;;  %p53_p0 = scmp.ne.s32.totalorder %s144_s0, %s52_s13  ;;  %s16_s10 = int_to_ptr.vmem [resolvable:$true] %s15_s10 }
   0x3   :  { %p56_p1 = scmp.lt.u32.totalorder %s52_s13, %s144_s0 }
   0x5   :  { %p58_p2 = pnand %p56_p1, %p53_p0 }
   0x7   :  { %61 = shalt.err (!%p58_p2)
}
   0x8   :  { %s62_s18 = scalar_lea.vmem %s16_s10, 64  ;;  %p67_p4 = scmp.lt.s32.totalorder %s16_s10, %s16_s10 }
   0x9   :  { %p63_p3 = scmp.ne.s32.totalorder %s16_s10, %s62_s18  ;;  %p68_p5 = scmp.lt.s32.totalorder %s62_s18, %s62_s18 }
   0xb   :  { %p69_p6 = por %p68_p5, %p67_p4 }
   0xd   :  { %p70_p7 = pnand %p69_p6, %p63_p3 }
   0xf   :  { %73 = shalt.err (!%p70_p7)
}
  0x10   :  { %18 = dma.hbm_to_vmem [thread:$0]  %s144_s0, 64, %s16_s10, [#allocation3]  }
  0x11   :  { %96 = dma.done.wait [#allocation3], 64  }
  0x12   :  { %97 = vsyncadd [#allocation3], 4294967232  ;;  %s101_s21 = smov [#allocation5]   ;;  %v24_v0 = vld [vmem:[#allocation2] sm:$0xf] }
  0x13   :  { %s40_s22 = sshll.u32 %s101_s21, 4  ;;  %v49_v1 = vld [vmem:[%s145_s1] ss:$0 sm:$0xff]  ;;  %s41_s22 = int_to_ptr.vmem [resolvable:$true] %s40_s22 }
  0x14   :  { %v32_v2 = vmul.f32 %v49_v1, %v24_v0  ;;  %s74_s25 = scalar_lea.vmem %s41_s22, 64  ;;  %p79_p9 = scmp.lt.s32.totalorder %s41_s22, %s41_s22 }
  0x15   :  { %p75_p8 = scmp.ne.s32.totalorder %s41_s22, %s74_s25  ;;  %p80_p10 = scmp.lt.s32.totalorder %s74_s25, %s74_s25 }
  0x16   :  { %33 = vst [vmem:[#allocation5] sm:$0xf] %v32_v2 }
  0x17   :  { %p81_p11 = por %p80_p10, %p79_p9 }
  0x19   :  { %p82_p12 = pnand %p81_p11, %p75_p8 }
  0x1b   :  { %85 = shalt.err (!%p82_p12)
}
  0x1c   :  { %s86_s27 = scalar_lea.hbm %s146_s2, 64 }
  0x1d   :  { %p87_p13 = scmp.ne.s32.totalorder %s146_s2, %s86_s27  ;;  %p90_p0 = scmp.lt.u32.totalorder %s86_s27, %s146_s2 }
  0x1f   :  { %p92_p1 = pnand %p90_p0, %p87_p13 }
  0x21   :  { %95 = shalt.err (!%p92_p1)
}
  0x22   :  { %43 = dma.vmem_to_hbm [thread:$0]  %s41_s22, 64, %s146_s2, [#allocation4]  }
  0x23   :  { %98 = dma.done.wait [#allocation4], 64  }
  0x24   :  { %99 = vsyncadd [#allocation4], 4294967232 }
  0x25   :  { %47 = vsyncpa [#allocation3], 1 }
  0x26   :  { %48 = vsyncpa [#allocation4], 1 }

</bundles_post_ra>
